<compile_context>
chip_gen: v7x
topology: tpu7x:2x2x1
jax: 0.10.0
libtpu: 0.0.40
codegen_flags: <defaults>
</compile_context>

<pallas_src>
import jax
import jax.numpy as jnp
from jax.experimental import pallas as pl
from jax.experimental.pallas import tpu as pltpu


def _round_up(n, m):
    return ((n + m - 1) // m) * m


def _pad_to(a, shape):
    widths = [(0, t - s) for s, t in zip(a.shape, shape)]
    if all(w == (0, 0) for w in widths):
        return a
    return jnp.pad(a, widths)


# ----------------------------------------------------------------------------
# Kernel: one (batch, spatial-tile) block through fc1 -> ReLU -> fc2
#   x_ref : [Cp, TS]   f32 (cast to bf16 in-kernel; cast hides under the MXU)
#   w1_ref: [Hid, Cp]  bf16   b1_ref: [Hid, 1] f32
#   w2_ref: [Out, Hid] bf16   b2_ref: [Out, 1] f32
#   o_ref : [Out, TS]  out dtype
# ----------------------------------------------------------------------------
def _conv_mlp_kernel(x_ref, w1_ref, b1_ref, w2_ref, b2_ref, o_ref):
    x = x_ref[...].astype(w1_ref.dtype)
    # fc1 (1x1x1 conv == channel matmul), f32 accumulation on the MXU
    h = jnp.dot(w1_ref[...], x, preferred_element_type=jnp.float32)
    # norm = Identity; act = ReLU; Dropout(0.0) = identity
    h = jnp.maximum(h + b1_ref[...], 0.0)
    # fc2
    out = jnp.dot(w2_ref[...], h.astype(w2_ref.dtype),
                  preferred_element_type=jnp.float32)
    o_ref[...] = (out + b2_ref[...]).astype(o_ref.dtype)


# ----------------------------------------------------------------------------
# Wrapper: layout plumbing (reshapes only, no transposes) + pallas_call
# ----------------------------------------------------------------------------
def conv_mlp_pallas(x, params, *, compute_dtype=jnp.bfloat16,
                    spatial_tile=512, out_dtype=None):
    """x: [B, C, D, H, W] (Conv3d layout). Returns [B, out_features, D, H, W]."""
    B, C, D, H, W = x.shape
    w1, b1 = params["w1"], params["b1"]   # [hid, in],  [hid]  (PyTorch layout)
    w2, b2 = params["w2"], params["b2"]   # [out, hid], [out]
    Hid, Cin = w1.shape
    Cout, Hid2 = w2.shape
    assert Cin == C and Hid2 == Hid
    out_dtype = out_dtype or x.dtype

    S = D * H * W
    x_r = x.reshape(B, C, S)              # free reshape (no data movement)

    # Channel pad only when needed (bf16 sublane pack); real nets: no-op pass.
    Cp = _round_up(C, 16)
    # Lane tile over spatial positions (multiple of 128 -> unmasked stores).
    TS = _round_up(min(spatial_tile, _round_up(S, 128)), 128)
    Sp = _round_up(S, TS)
    # Keep >= 2 grid tiles so both v7x TensorCores get work.
    while B * (Sp // TS) < 2 and TS > 128:
        TS //= 2
        Sp = _round_up(S, TS)

    if (Cp, Sp) != (C, S):
        x_r = jnp.pad(x_r, ((0, 0), (0, Cp - C), (0, Sp - S)))

    w1_p = _pad_to(w1, (Hid, Cp)).astype(compute_dtype)
    w2_p = w2.astype(compute_dtype)
    b1_p = b1.reshape(Hid, 1).astype(jnp.float32)
    b2_p = b2.reshape(Cout, 1).astype(jnp.float32)

    grid = (B, Sp // TS)

    # VMEM budget derived from actual usage (+25% headroom), clamped to chip.
    cdt = jnp.dtype(compute_dtype).itemsize
    odt = jnp.dtype(out_dtype).itemsize
    need = (Hid * Cp * cdt                     # w1 (single-buffered)
            + Cout * Hid * cdt                 # w2 (single-buffered)
            + _round_up(Hid, 8) * 128 * 4      # b1 ([Hid,1] pads lanes to 128)
            + _round_up(Cout, 8) * 128 * 4     # b2
            + 2 * TS * Cp * 4                  # x tiles (f32, double-buffered)
            + 2 * TS * Cout * odt              # out tiles (double-buffered)
            + TS * Hid * 4)                    # f32 intermediate h scratch
    try:
        vmem_cap = pltpu.get_tpu_info().vmem_capacity_bytes
    except Exception:
        vmem_cap = 64 * 1024 * 1024
    vmem_limit = max(16 * 1024 * 1024,
                     min(int(need * 1.25) + (1 << 20), int(vmem_cap * 9 // 10)))

    flops = 2 * B * Sp * (Cp * Hid + Hid * Cout)
    bytes_accessed = (B * Sp * Cp * 4 + Hid * Cp * cdt + Cout * Hid * cdt
                      + Hid * 4 + Cout * 4 + B * Sp * Cout * odt)
    cost = pl.CostEstimate(flops=flops, transcendentals=0,
                           bytes_accessed=bytes_accessed)

    def make_in_specs(weight_pipeline_mode):
        wkw = ({} if weight_pipeline_mode is None
               else {"pipeline_mode": weight_pipeline_mode})
        return [
            pl.BlockSpec((None, Cp, TS), lambda b, s: (b, 0, s)),  # streamed x
            pl.BlockSpec((Hid, Cp), lambda b, s: (0, 0), **wkw),   # resident w1
            pl.BlockSpec((Hid, 1), lambda b, s: (0, 0), **wkw),    # resident b1
            pl.BlockSpec((Cout, Hid), lambda b, s: (0, 0), **wkw), # resident w2
            pl.BlockSpec((Cout, 1), lambda b, s: (0, 0), **wkw),   # resident b2
        ]

    def run(in_specs):
        return pl.pallas_call(
            _conv_mlp_kernel,
            out_shape=jax.ShapeDtypeStruct((B, Cout, Sp), out_dtype),
            grid=grid,
            in_specs=in_specs,
            out_specs=pl.BlockSpec((None, Cout, TS), lambda b, s: (b, 0, s)),
            compiler_params=pltpu.CompilerParams(
                dimension_semantics=("parallel", "parallel"),
                vmem_limit_bytes=vmem_limit,
            ),
            cost_estimate=cost,
        )(x_r, w1_p, b1_p, w2_p, b2_p)

    try:
        # Constant-index_map inputs: single-buffer to halve resident weight VMEM.
        out_p = run(make_in_specs(pl.Buffered(1)))
    except Exception:
        # TODO(synk): drop fallback once pl.Buffered(1) is guaranteed available;
        # fallback only costs VMEM (double-buffered resident weights).
        out_p = run(make_in_specs(None))

    if Sp != S:
        out_p = out_p[:, :, :S]
    return out_p.reshape(B, Cout, D, H, W)


# ----------------------------------------------------------------------------
# Deterministic parameter init (shapes mirror ConvMlp with 1x1x1 Conv3d,
# weights kept in PyTorch [out, in] order).
# ----------------------------------------------------------------------------
def init_conv_mlp_params(key, in_features, hidden_features=None,
                         out_features=None):
    hidden_features = hidden_features or in_features
    out_features = out_features or in_features
    k1, k2, k3, k4 = jax.random.split(key, 4)
    w1 = jax.random.normal(k1, (hidden_features, in_features), jnp.float32) * 0.02
    b1 = jax.random.normal(k2, (hidden_features,), jnp.float32) * 0.02
    w2 = jax.random.normal(k3, (out_features, hidden_features), jnp.float32) * 0.02
    b2 = jax.random.normal(k4, (out_features,), jnp.float32) * 0.02
    return {"w1": w1, "b1": b1, "w2": w2, "b2": b2}


# ----------------------------------------------------------------------------
# Pure-JAX reference (mirrors the kernel's bf16-matmul / f32-accumulate math)
# ----------------------------------------------------------------------------
def conv_mlp_ref(x, p, compute_dtype=jnp.bfloat16):
    B, C, D, H, W = x.shape
    xr = x.reshape(B, C, -1).astype(compute_dtype)
    h = jnp.einsum("hc,bcs->bhs", p["w1"].astype(compute_dtype), xr,
                   preferred_element_type=jnp.float32) + p["b1"][None, :, None]
    h = jnp.maximum(h, 0.0)
    o = jnp.einsum("oh,bhs->bos", p["w2"].astype(compute_dtype),
                   h.astype(compute_dtype),
                   preferred_element_type=jnp.float32) + p["b2"][None, :, None]
    return o.reshape(B, -1, D, H, W)


if __name__ == "__main__":
    key = jax.random.PRNGKey(0)
    kx, kp, kx2, kp2 = jax.random.split(key, 4)

    # Config 1: ConvMlp(in=4, hidden=32), Conv3d input [B, C, D, H, W].
    # S = 2*8*8 = 128 -> one 128-lane tile per batch element, grid of 2.
    B, C, D, H, W = 2, 4, 2, 8, 8
    HIDDEN = 32
    x = jax.random.normal(kx, (B, C, D, H, W), jnp.float32)
    params = init_conv_mlp_params(kp, in_features=C, hidden_features=HIDDEN)
    out = jax.block_until_ready(conv_mlp_pallas(x, params))
    ref = conv_mlp_ref(x, params)
    assert out.shape == (B, C, D, H, W), out.shape
    err = float(jnp.max(jnp.abs(out - ref)))
    assert jnp.allclose(out, ref, atol=2e-4, rtol=2e-4), f"max abs err {err}"

    # Config 2: exercises channel/spatial padding and out_features != in
    # (C=6 -> Cp=16, S=3*5*7=105 -> Sp=128, out_features=8).
    B2, C2, D2, H2, W2 = 2, 6, 3, 5, 7
    x2 = jax.random.normal(kx2, (B2, C2, D2, H2, W2), jnp.float32)
    params2 = init_conv_mlp_params(kp2, in_features=C2, hidden_features=16,
                                   out_features=8)
    out2 = jax.block_until_ready(conv_mlp_pallas(x2, params2))
    ref2 = conv_mlp_ref(x2, params2)
    assert out2.shape == (B2, 8, D2, H2, W2), out2.shape
    err2 = float(jnp.max(jnp.abs(out2 - ref2)))
    assert jnp.allclose(out2, ref2, atol=2e-4, rtol=2e-4), f"max abs err {err2}"

    print("KERNEL_OK")
</pallas_src>

<mosaic_0001>
module attributes {stable_mosaic.version = 11 : i64} {
  func.func @_conv_mlp_kernel(%arg0: i32, %arg1: i32, %arg2: memref<1x16x128xf32, #tpu.memory_space<vmem>>, %arg3: memref<32x16xbf16, #tpu.memory_space<vmem>>, %arg4: memref<32x1xf32, #tpu.memory_space<vmem>>, %arg5: memref<4x32xbf16, #tpu.memory_space<vmem>>, %arg6: memref<4x1xf32, #tpu.memory_space<vmem>>, %arg7: memref<1x4x128xf32, #tpu.memory_space<vmem>>) attributes {dimension_semantics = [#tpu.dimension_semantics<parallel>, #tpu.dimension_semantics<parallel>], iteration_bounds = array<i64: 2, 1>, scalar_prefetch = 0 : i64, scratch_operands = 0 : i64, tpu.core_type = #tpu.core_type<tc>, window_params = [{transform_indices = @transform_0, window_bounds = array<i64: 1, 16, 128>}, {pipeline_mode = #tpu.pipeline_mode<synchronous>, transform_indices = @transform_1, window_bounds = array<i64: 32, 16>}, {pipeline_mode = #tpu.pipeline_mode<synchronous>, transform_indices = @transform_2, window_bounds = array<i64: 32, 1>}, {pipeline_mode = #tpu.pipeline_mode<synchronous>, transform_indices = @transform_3, window_bounds = array<i64: 4, 32>}, {pipeline_mode = #tpu.pipeline_mode<synchronous>, transform_indices = @transform_4, window_bounds = array<i64: 4, 1>}, {transform_indices = @transform_5, window_bounds = array<i64: 1, 4, 128>}]} {
    %c0 = arith.constant 0 : index
    %c0_0 = arith.constant 0 : index
    %c0_1 = arith.constant 0 : index
    %0 = vector.load %arg2[%c0, %c0_0, %c0_1] : memref<1x16x128xf32, #tpu.memory_space<vmem>>, vector<1x16x128xf32>
    %1 = vector.shape_cast %0 : vector<1x16x128xf32> to vector<16x128xf32>
    %2 = arith.truncf %1 : vector<16x128xf32> to vector<16x128xbf16>
    %c0_2 = arith.constant 0 : index
    %c0_3 = arith.constant 0 : index
    %3 = vector.load %arg3[%c0_2, %c0_3] : memref<32x16xbf16, #tpu.memory_space<vmem>>, vector<32x16xbf16>
    %cst = arith.constant dense<0.000000e+00> : vector<32x128xf32>
    %4 = tpu.matmul %3, %2, %cst {dimension_numbers = #tpu.dot_dimension_numbers<[1], [0], [0], [1], [0, 0, 1, 1], [], []>} : vector<32x16xbf16>, vector<16x128xbf16>, vector<32x128xf32> -> vector<32x128xf32>
    %c0_4 = arith.constant 0 : index
    %c0_5 = arith.constant 0 : index
    %5 = vector.load %arg4[%c0_4, %c0_5] : memref<32x1xf32, #tpu.memory_space<vmem>>, vector<32x1xf32>
    %6 = vector.broadcast %5 : vector<32x1xf32> to vector<32x128xf32>
    %7 = arith.addf %4, %6 : vector<32x128xf32>
    %cst_6 = arith.constant 0.000000e+00 : f32
    %8 = vector.broadcast %cst_6 : f32 to vector<32x128xf32>
    %9 = arith.maximumf %7, %8 : vector<32x128xf32>
    %c0_7 = arith.constant 0 : index
    %c0_8 = arith.constant 0 : index
    %10 = vector.load %arg5[%c0_7, %c0_8] : memref<4x32xbf16, #tpu.memory_space<vmem>>, vector<4x32xbf16>
    %11 = arith.truncf %9 : vector<32x128xf32> to vector<32x128xbf16>
    %cst_9 = arith.constant dense<0.000000e+00> : vector<4x128xf32>
    %12 = tpu.matmul %10, %11, %cst_9 {dimension_numbers = #tpu.dot_dimension_numbers<[1], [0], [0], [1], [0, 0, 1, 1], [], []>} : vector<4x32xbf16>, vector<32x128xbf16>, vector<4x128xf32> -> vector<4x128xf32>
    %c0_10 = arith.constant 0 : index
    %c0_11 = arith.constant 0 : index
    %13 = vector.load %arg6[%c0_10, %c0_11] : memref<4x1xf32, #tpu.memory_space<vmem>>, vector<4x1xf32>
    %14 = vector.broadcast %13 : vector<4x1xf32> to vector<4x128xf32>
    %15 = arith.addf %12, %14 : vector<4x128xf32>
    %c0_12 = arith.constant 0 : index
    %c0_13 = arith.constant 0 : index
    %c0_14 = arith.constant 0 : index
    %16 = vector.load %arg7[%c0_12, %c0_13, %c0_14] : memref<1x4x128xf32, #tpu.memory_space<vmem>>, vector<1x4x128xf32>
    %17 = vector.shape_cast %16 : vector<1x4x128xf32> to vector<4x128xf32>
    %18 = vector.shape_cast %15 : vector<4x128xf32> to vector<1x4x128xf32>
    tpu.vector_store %arg7[%c0_12, %c0_13, %c0_14], %18 {strides = array<i32>} : memref<1x4x128xf32, #tpu.memory_space<vmem>>, vector<1x4x128xf32>,
    return
  }
  func.func @transform_0(%arg0: i32, %arg1: i32) -> (i32, i32, i32) {
    %c0_i32 = arith.constant 0 : i32
    %c0_i32_0 = arith.constant 0 : i32
    return %arg0, %c0_i32, %arg1 : i32, i32, i32
  }
  func.func @transform_1(%arg0: i32, %arg1: i32) -> (i32, i32) {
    %c0_i32 = arith.constant 0 : i32
    %c0_i32_0 = arith.constant 0 : i32
    %c0_i32_1 = arith.constant 0 : i32
    return %c0_i32, %c0_i32_0 : i32, i32
  }
  func.func @transform_2(%arg0: i32, %arg1: i32) -> (i32, i32) {
    %c0_i32 = arith.constant 0 : i32
    %c0_i32_0 = arith.constant 0 : i32
    %c0_i32_1 = arith.constant 0 : i32
    return %c0_i32, %c0_i32_0 : i32, i32
  }
  func.func @transform_3(%arg0: i32, %arg1: i32) -> (i32, i32) {
    %c0_i32 = arith.constant 0 : i32
    %c0_i32_0 = arith.constant 0 : i32
    %c0_i32_1 = arith.constant 0 : i32
    return %c0_i32, %c0_i32_0 : i32, i32
  }
  func.func @transform_4(%arg0: i32, %arg1: i32) -> (i32, i32) {
    %c0_i32 = arith.constant 0 : i32
    %c0_i32_0 = arith.constant 0 : i32
    %c0_i32_1 = arith.constant 0 : i32
    return %c0_i32, %c0_i32_0 : i32, i32
  }
  func.func @transform_5(%arg0: i32, %arg1: i32) -> (i32, i32, i32) {
    %c0_i32 = arith.constant 0 : i32
    %c0_i32_0 = arith.constant 0 : i32
    return %arg0, %c0_i32, %arg1 : i32, i32, i32
  }
}

module attributes {stable_mosaic.version = 11 : i64} {
  func.func @_conv_mlp_kernel(%arg0: i32, %arg1: i32, %arg2: memref<1x16x128xf32, #tpu.memory_space<vmem>>, %arg3: memref<32x16xbf16, #tpu.memory_space<vmem>>, %arg4: memref<32x1xf32, #tpu.memory_space<vmem>>, %arg5: memref<4x32xbf16, #tpu.memory_space<vmem>>, %arg6: memref<4x1xf32, #tpu.memory_space<vmem>>, %arg7: memref<1x4x128xf32, #tpu.memory_space<vmem>>) attributes {dimension_semantics = [#tpu.dimension_semantics<parallel>, #tpu.dimension_semantics<parallel>], iteration_bounds = array<i64: 2, 1>, scalar_prefetch = 0 : i64, scratch_operands = 0 : i64, tpu.core_type = #tpu.core_type<tc>, window_params = [{transform_indices = @transform_0, window_bounds = array<i64: 1, 16, 128>}, {pipeline_mode = #tpu.pipeline_mode<synchronous>, transform_indices = @transform_1, window_bounds = array<i64: 32, 16>}, {pipeline_mode = #tpu.pipeline_mode<synchronous>, transform_indices = @transform_2, window_bounds = array<i64: 32, 1>}, {pipeline_mode = #tpu.pipeline_mode<synchronous>, transform_indices = @transform_3, window_bounds = array<i64: 4, 32>}, {pipeline_mode = #tpu.pipeline_mode<synchronous>, transform_indices = @transform_4, window_bounds = array<i64: 4, 1>}, {transform_indices = @transform_5, window_bounds = array<i64: 1, 4, 128>}]} {
    %c0 = arith.constant 0 : index
    %c0_0 = arith.constant 0 : index
    %c0_1 = arith.constant 0 : index
    %0 = vector.load %arg2[%c0, %c0_0, %c0_1] : memref<1x16x128xf32, #tpu.memory_space<vmem>>, vector<1x16x128xf32>
    %1 = vector.shape_cast %0 : vector<1x16x128xf32> to vector<16x128xf32>
    %2 = arith.truncf %1 : vector<16x128xf32> to vector<16x128xbf16>
    %c0_2 = arith.constant 0 : index
    %c0_3 = arith.constant 0 : index
    %3 = vector.load %arg3[%c0_2, %c0_3] : memref<32x16xbf16, #tpu.memory_space<vmem>>, vector<32x16xbf16>
    %cst = arith.constant dense<0.000000e+00> : vector<32x128xf32>
    %4 = tpu.matmul %3, %2, %cst {dimension_numbers = #tpu.dot_dimension_numbers<[1], [0], [0], [1], [0, 0, 1, 1], [], []>} : vector<32x16xbf16>, vector<16x128xbf16>, vector<32x128xf32> -> vector<32x128xf32>
    %c0_4 = arith.constant 0 : index
    %c0_5 = arith.constant 0 : index
    %5 = vector.load %arg4[%c0_4, %c0_5] : memref<32x1xf32, #tpu.memory_space<vmem>>, vector<32x1xf32>
    %6 = vector.broadcast %5 : vector<32x1xf32> to vector<32x128xf32>
    %7 = arith.addf %4, %6 : vector<32x128xf32>
    %cst_6 = arith.constant 0.000000e+00 : f32
    %8 = vector.broadcast %cst_6 : f32 to vector<32x128xf32>
    %9 = arith.maximumf %7, %8 : vector<32x128xf32>
    %c0_7 = arith.constant 0 : index
    %c0_8 = arith.constant 0 : index
    %10 = vector.load %arg5[%c0_7, %c0_8] : memref<4x32xbf16, #tpu.memory_space<vmem>>, vector<4x32xbf16>
    %11 = arith.truncf %9 : vector<32x128xf32> to vector<32x128xbf16>
    %cst_9 = arith.constant dense<0.000000e+00> : vector<4x128xf32>
    %12 = tpu.matmul %10, %11, %cst_9 {dimension_numbers = #tpu.dot_dimension_numbers<[1], [0], [0], [1], [0, 0, 1, 1], [], []>} : vector<4x32xbf16>, vector<32x128xbf16>, vector<4x128xf32> -> vector<4x128xf32>
    %c0_10 = arith.constant 0 : index
    %c0_11 = arith.constant 0 : index
    %13 = vector.load %arg6[%c0_10, %c0_11] : memref<4x1xf32, #tpu.memory_space<vmem>>, vector<4x1xf32>
    %14 = vector.broadcast %13 : vector<4x1xf32> to vector<4x128xf32>
    %15 = arith.addf %12, %14 : vector<4x128xf32>
    %c0_12 = arith.constant 0 : index
    %c0_13 = arith.constant 0 : index
    %c0_14 = arith.constant 0 : index
    %16 = vector.load %arg7[%c0_12, %c0_13, %c0_14] : memref<1x4x128xf32, #tpu.memory_space<vmem>>, vector<1x4x128xf32>
    %17 = vector.shape_cast %16 : vector<1x4x128xf32> to vector<4x128xf32>
    %18 = vector.shape_cast %15 : vector<4x128xf32> to vector<1x4x128xf32>
    tpu.vector_store %arg7[%c0_12, %c0_13, %c0_14], %18 {strides = array<i32>} : memref<1x4x128xf32, #tpu.memory_space<vmem>>, vector<1x4x128xf32>,
    return
  }
  func.func @transform_0(%arg0: i32, %arg1: i32) -> (i32, i32, i32) {
    %c0_i32 = arith.constant 0 : i32
    %c0_i32_0 = arith.constant 0 : i32
    return %arg0, %c0_i32, %arg1 : i32, i32, i32
  }
  func.func @transform_1(%arg0: i32, %arg1: i32) -> (i32, i32) {
    %c0_i32 = arith.constant 0 : i32
    %c0_i32_0 = arith.constant 0 : i32
    %c0_i32_1 = arith.constant 0 : i32
    return %c0_i32, %c0_i32_0 : i32, i32
  }
  func.func @transform_2(%arg0: i32, %arg1: i32) -> (i32, i32) {
    %c0_i32 = arith.constant 0 : i32
    %c0_i32_0 = arith.constant 0 : i32
    %c0_i32_1 = arith.constant 0 : i32
    return %c0_i32, %c0_i32_0 : i32, i32
  }
  func.func @transform_3(%arg0: i32, %arg1: i32) -> (i32, i32) {
    %c0_i32 = arith.constant 0 : i32
    %c0_i32_0 = arith.constant 0 : i32
    %c0_i32_1 = arith.constant 0 : i32
    return %c0_i32, %c0_i32_0 : i32, i32
  }
  func.func @transform_4(%arg0: i32, %arg1: i32) -> (i32, i32) {
    %c0_i32 = arith.constant 0 : i32
    %c0_i32_0 = arith.constant 0 : i32
    %c0_i32_1 = arith.constant 0 : i32
    return %c0_i32, %c0_i32_0 : i32, i32
  }
  func.func @transform_5(%arg0: i32, %arg1: i32) -> (i32, i32, i32) {
    %c0_i32 = arith.constant 0 : i32
    %c0_i32_0 = arith.constant 0 : i32
    return %arg0, %c0_i32, %arg1 : i32, i32, i32
  }
}

</mosaic_0001>

<bundles_post_ra>
// kernel: tpu_custom_call.1
= control target key start
LH: loop header
LB: loop body
LE: loop exit
PB: predicated region body
PF: predicated region fallthrough
CT: control target
= control target key end

     0   :  { %10 = vsyncpa [#allocation3], 0  ;;  %s845_s0 = inlined_call_operand.vmem [shape: f32[2,16,128], index: 0, kind: input, shape index: {}]   ;;  %s846_s1 = inlined_call_operand.vmem [shape: bf16[32,16], index: 1, kind: input, shape index: {}]   ;;  %s847_s2 = inlined_call_operand.vmem [shape: f32[32,1], index: 2, kind: input, shape index: {}]   ;;  %s848_s3 = inlined_call_operand.vmem [shape: bf16[4,32], index: 3, kind: input, shape index: {}]   ;;  %s849_s4 = inlined_call_operand.vmem [shape: f32[4,1], index: 4, kind: input, shape index: {}]   ;;  %s850_s5 = inlined_call_operand.hbm [shape: f32[2,4,128], index: 5, kind: output, shape index: {}]  }
   0x1   :  { %12 = vsyncpa [#allocation3 + $0x1], 0  ;;  %s707_s18 = smov 0   ;;  %s709_s19 = smov 0  }
   0x2   :  { %s711_s20 = smov 0   ;;  %s713_s21 = smov 0  }
   0x3   :  { %s715_s22 = smov 0   ;;  %s717_s23 = smov 0  }
   0x4 LB: > { %s493_s24 = sadd.s32 4294967295, %s671_s23   ;;  %s494_s25 = sadd.s32 4294967294, %s671_s23   ;;  %s671_s23 = sphi %s717_s23, %s18_s23   ;;  %s667_s22 = sphi %s715_s22, %s857_s22   ;;  %s663_s21 = sphi %s713_s21, %s856_s21   ;;  %s659_s20 = sphi %s711_s20, %s855_s20   ;;  %s655_s19 = sphi %s709_s19, %s854_s19   ;;  %s651_s18 = sphi %s707_s18, %s853_s18  }
   0x5   : > { %s30_s26 = sadd.s32 1, %s667_s22  ;;  %s151_s27 = sadd.s32 1, %s659_s20 }
   0x6   : > { %p32_p0 = scmp.ge.s32.totalorder %s30_s26, 2  ;;  %p161_p1 = scmp.ne.s32.totalorder %s659_s20, %s655_s19 }
   0x7   : > { %p162_p2 = scmp.eq.s32.totalorder %s493_s24, 1  ;;  %p167_p3 = scmp.ne.s32.totalorder %s655_s19, %s651_s18 }
   0x8   : > { %s859_s26 = smov (%p32_p0, %s30_s26), 0  ;;  %p168_p5 = scmp.eq.s32.totalorder %s494_s25, 1 }
   0x9   : > { %p747_p4 = por %p162_p2, %p161_p1  ;;  %s146_s29 = ssub.s32 %s667_s22, %s859_s26 }
   0xa   : > { %p497_p6 = scmp.ge.s32.totalorder %s671_s23, 1  ;;  %p149_p7 = scmp.eq.s32.totalorder %s146_s29, 0 }
   0xb   : > { %p754_p8 = por %p168_p5, %p167_p3  ;;  %p209_p9 = scmp.lt.s32.totalorder %s671_s23, 3 }
   0xc   : > { %s760_s6 = scalar_select %p149_p7, %s659_s20, %s151_s27  }
   0xd   : > { %p210_p10 = pnand %p497_p6, %p209_p9 }
   0xe   : > { %p240_p11 = scmp.lt.s32.totalorder (!%p210_p10), %s663_s21, 1  ;;  %v591_v0 = vld [vmem:[%s846_s1] sm:$0xff] (!%p210_p10)   ;;  %vm290_vm0 = vcmask (!%p210_p10), 130048   ;;  %v258_v2 = vld [vmem:[%s847_s2 + $0x10] sm:$0xff] (!%p210_p10)  ;;  %v673_v3 = vmov (!%p210_p10), 0   ;;  %v257_v4 = vld [vmem:[%s847_s2 + $0x8] sm:$0xff] (!%p210_p10) }
   0xf   : > { %213 = sbr.rel (%p210_p10) target bundleno = 489 (0x1e9), region = 40  ;;  %519 = vmatprep.mubr.msk.bf16.mxu0 (!%p210_p10), %vm290_vm0, %v591_v0  ;;  %v256_v1 = vld [vmem:[%s847_s2] sm:$0xff] (!%p210_p10)  ;;  %589 = vset.pattern.permute.xlu0 (!%p210_p10), %v673_v3  ;;  %v259_v5 = vld [vmem:[%s847_s2 + $0x18] sm:$0xff] (!%p210_p10)  ;;  %v592_v9 = vld [vmem:[%s846_s1 + $0x8] sm:$0xff] (!%p210_p10)   ;;  %v674_v11 = vmov (!%p210_p10), 0.0   ;;  %vm675_vm1 = vmmov (!%p210_p10), 0  }
  0x10   : > { %590 = vset.pattern.permute.xlu1 (!%p210_p10), %v673_v3  ;;  %262 = vperm.xlu0 (!%p210_p10), %589, %v256_v1   ;;  %v353_v10 = vld [vmem:[%s849_s4] sm:$0xf] (!%p210_p10)  ;;  %vm359_vm2 = vcmask (!%p210_p10), 261120   ;;  %s237_s13 = sand.u32 (!%p210_p10), 1, %s655_s19   ;;  %s507_s15 = sshll.u32 (!%p210_p10), %s663_s21, 6 }
  0x11   : > { %272 = vperm.xlu1 (!%p210_p10), %590, %v258_v2   ;;  %523 = vmatprep.subr.bf16.mxu1 (!%p210_p10), %v674_v11  ;;  %v350_v30 = vld [vmem:[%s848_s3] sm:$0x3] (!%p210_p10)  ;;  %s798_s27 = scalar_lea.hbm (!%p210_p10), %s850_s5, %s507_s15  ;;  %s676_s7 = smov (!%p210_p10), [#allocation2]  }
  0x12   : > { %527 = vmatprep.mubr.msk.bf16.mxu1 (!%p210_p10), %vm675_vm1, %v674_v11  ;;  %s597_s8 = sshll.u32 (!%p210_p10), %s676_s7, 4  ;;  %s598_s8 = int_to_ptr.vmem [resolvable:$false] %s597_s8 }
  0x14   : > { %267 = vperm.xlu0 (!%p210_p10), %589, %v257_v4  }
  0x15   : > { %277 = vperm.xlu1 (!%p210_p10), %590, %v259_v5  }
  0x16   : > { %s241_s9 = scalar_select %p240_p11, %s663_s21, 1 }
  0x17   : > { %s405_s21 = scalar_lea.sflag [#allocation3], %s237_s13 }
  0x18   : > { %s510_s14 = sshll.u32 %s241_s9, 4  ;;  %356 = vperm.xlu0 %589, %v353_v10   ;;  %s599_s9 = scalar_lea.vmem %s598_s8, 128 }
  0x19   : > { %s247_s17 = scalar_lea.vmem %s845_s0, %s510_s14  ;;  %s498_s14 = sshll.u32 %s237_s13, 2 }
  0x1a   : > { %v249_v6 = vld [vmem:[%s247_s17] sm:$0xff]  ;;  %v250_v7 = vld [vmem:[%s247_s17 + $0x8] sm:$0xff]  ;;  %s239_s16 = scalar_lea.vmem [#allocation2], %s498_s14 }
  0x1b   : > { %v251_v8 = vpack.c.bf16 %v250_v7, %v249_v6  ;;  %s419_s17 = sshll.u32 %s239_s16, 4  ;;  %s800_s17 = int_to_ptr.vmem [resolvable:$true] %s419_s17 }
  0x1c   : > { %s593_s29 = scalar_lea.vmem %s800_s17, 64  ;;  %p600_p1 = scmp.lt.s32.totalorder %s800_s17, %s598_s8 }
  0x1d   : > { %517 = vmatprep.subr.bf16.mxu0 %v251_v8  ;;  %p594_p12 = scmp.ne.s32.totalorder %s800_s17, %s593_s29  ;;  %p601_p2 = scmp.lt.s32.totalorder %s599_s9, %s593_s29 }
  0x1e   : > { %518 = vmatpush3.bf16.msra.mxu0 %v251_v8 }
  0x1f   : > { %p595_p13 = pnand %p594_p12, %p747_p4  ;;  %p602_p3 = por %p601_p2, %p600_p1 }
  0x21   : > { %520 = vmatmul.mubr.msk.bf16.vlgmr.msra.gmra.mrb[0].mxu0 %vm290_vm0, %v592_v9  ;;  %p596_p0 = pneg %p595_p13 }
  0x23   : > { %p603_p5 = pnand %p602_p3, %p596_p0 }
  0x8f   : > { %v263_v13 = vpop.permute.xlu0 %262 }
  0x90   : > { %v273_v12 = vpop.permute.xlu1 %272 }
  0x93   : > { %v268_v20 = vpop.permute.xlu0 %267 }
  0x94   : > { %v278_v15 = vpop.permute.xlu1 %277 }
  0x97   : > { %v357_v31 = vpop.permute.xlu0 %356 }
  0xf4   : > { %v521_v14 = vpop.f32.mrb[0].mxu0 }
  0xf5   : > { %v340_v16 = vadd.f32 %v521_v14, %v273_v12  ;;  %v331_v17 = vpop.f32.mrb[1].mxu0 }
  0xf6   : > { %v332_v18 = vadd.f32 %v331_v17, %v263_v13  ;;  %v522_v19 = vpop.f32.mrb[2].mxu0 }
  0xf7   : > { %v343_v21 = vadd.f32 %v522_v19, %v278_v15  ;;  %v334_v22 = vpop.f32.mrb[3].mxu0  ;;  %v348_v24 = vmax.f32 %v340_v16, 0.0 }
  0xf8   : > { %v335_v23 = vadd.f32 %v334_v22, %v268_v20  ;;  %v346_v26 = vmax.f32 %v332_v18, 0.0 }
  0xf9   : > { %v349_v25 = vmax.f32 %v343_v21, 0.0 }
  0xfa   : > { %v347_v27 = vmax.f32 %v335_v23, 0.0 }
  0xfb   : > { %v352_v28 = vpack.c.bf16 %v349_v25, %v348_v24 }
  0xfc   : > { %v351_v29 = vpack.c.bf16 %v347_v27, %v346_v26 }
  0xfe   : > { %524 = vmatpush3.bf16.msra.mxu1 %v351_v29 }
  0xff   : > { %525 = vmatprep.subr.bf16.mxu1 %v674_v11 }
 0x102   : > { %526 = vmatpush3.bf16.msra.mxu1 %v352_v28 }
 0x105   : > { %528 = vmatmul.mubr.msk.bf16.vlgmr.msra.gmra.mrb[0].mxu1 %vm359_vm2, %v350_v30 }
 0x1d8   : > { %v397_v32 = vpop.f32.mrb[0].mxu1 }
 0x1d9   : > { %v398_v33 = vadd.f32 %v397_v32, %v357_v31  ;;  %v529_v34 = vpop.f32.mrb[1].mxu1 }
 0x1da   : > { %v400_v35 = vpop.f32.mrb[2].mxu1 }
 0x1db   : > { %403 = vst [vmem:[%s239_s16] sm:$0xf] %v398_v33  ;;  %v530_v36 = vpop.f32.mrb[3].mxu1 }
 0x1dc   : > { %606 = shalt.err (!%p603_p5)
}
 0x1dd   : > { %s607_s10 = scalar_lea.hbm %s798_s27, 64  ;;  %s611_s13 = scalar_lea.hbm %s850_s5, 128 }
 0x1de   : > { %p608_p6 = scmp.ne.s32.totalorder %s798_s27, %s607_s10  ;;  %p612_p10 = scmp.lt.u32.totalorder %s798_s27, %s850_s5 }
 0x1df   : > { %p613_p11 = scmp.lt.u32.totalorder %s611_s13, %s607_s10  ;;  %p615_p13 = scmp.lt.u32.totalorder %s607_s10, %s798_s27 }
 0x1e0   : > { %p609_p7 = pnand %p608_p6, %p747_p4 }
 0x1e1   : > { %p614_p12 = por %p613_p11, %p612_p10 }
 0x1e2   : > { %p610_p9 = pneg %p609_p7 }
 0x1e3   : > { %p616_p0 = por %p615_p13, %p614_p12 }
 0x1e5   : > { %p617_p1 = pnand %p616_p0, %p610_p9 }
 0x1e7   : > { %620 = shalt.err (!%p617_p1)
}
 0x1e8   : > { %531 = dma.vmem_to_hbm [thread:$0]  (%p747_p4), %s800_s17, 64, %s798_s27, %s405_s21  }
 0x1e9 PF: > { %p537_p2 = scmp.ge.s32.totalorder %s671_s23, 2  ;;  %s431_s16 = sand.u32 1, %s651_s18  }
 0x1ea   : > { %s432_s24 = scalar_lea.sflag [#allocation3], %s431_s16 }
 0x1eb   : > { %p534_p3 = pnand %p537_p2, %p754_p8 }
 0x1ed   : > { %646 = dma.done.wait (!%p534_p3), %s432_s24, 64  }
 0x1ee   : > { %648 = vsyncadd (!%p534_p3), %s432_s24, 4294967232  ;;  %s18_s23 = sadd.s32 1, %s671_s23   ;;  %s853_s18 = smov %s655_s19 }
 0x1ef   : > { %p15_p5 = scmp.ge.s32.totalorder %s18_s23, 4   ;;  %s854_s19 = smov %s659_s20 }
 0x1f0   : > { %s855_s20 = smov %s760_s6  ;;  %s856_s21 = smov %s667_s22 }
 0x1f1   : > { %s857_s22 = smov %s859_s26  ;;  %17 = sbr.rel (!%p15_p5) target bundleno = 4 (0x4), region = 75 }
 0x1f8   :  { %437 = vsyncpa [#allocation3], 1 }
 0x1f9   :  { %439 = vsyncpa [#allocation3 + $0x1], 1 }

// kernel: tpu_custom_call.1
= control target key start
LH: loop header
LB: loop body
LE: loop exit
PB: predicated region body
PF: predicated region fallthrough
CT: control target
= control target key end

     0   :  { %10 = vsyncpa [#allocation3], 0  ;;  %s845_s0 = inlined_call_operand.vmem [shape: f32[2,16,128], index: 0, kind: input, shape index: {}]   ;;  %s846_s1 = inlined_call_operand.vmem [shape: bf16[32,16], index: 1, kind: input, shape index: {}]   ;;  %s847_s2 = inlined_call_operand.vmem [shape: f32[32,1], index: 2, kind: input, shape index: {}]   ;;  %s848_s3 = inlined_call_operand.vmem [shape: bf16[4,32], index: 3, kind: input, shape index: {}]   ;;  %s849_s4 = inlined_call_operand.vmem [shape: f32[4,1], index: 4, kind: input, shape index: {}]   ;;  %s850_s5 = inlined_call_operand.hbm [shape: f32[2,4,128], index: 5, kind: output, shape index: {}]  }
   0x1   :  { %12 = vsyncpa [#allocation3 + $0x1], 0  ;;  %s707_s18 = smov 0   ;;  %s709_s19 = smov 0  }
   0x2   :  { %s711_s20 = smov 0   ;;  %s713_s21 = smov 0  }
   0x3   :  { %s715_s22 = smov 0   ;;  %s717_s23 = smov 0  }
   0x4 LB: > { %s493_s24 = sadd.s32 4294967295, %s671_s23   ;;  %s494_s25 = sadd.s32 4294967294, %s671_s23   ;;  %s671_s23 = sphi %s717_s23, %s18_s23   ;;  %s667_s22 = sphi %s715_s22, %s857_s22   ;;  %s663_s21 = sphi %s713_s21, %s856_s21   ;;  %s659_s20 = sphi %s711_s20, %s855_s20   ;;  %s655_s19 = sphi %s709_s19, %s854_s19   ;;  %s651_s18 = sphi %s707_s18, %s853_s18  }
   0x5   : > { %s30_s26 = sadd.s32 1, %s667_s22  ;;  %s151_s27 = sadd.s32 1, %s659_s20 }
   0x6   : > { %p32_p0 = scmp.ge.s32.totalorder %s30_s26, 2  ;;  %p161_p1 = scmp.ne.s32.totalorder %s659_s20, %s655_s19 }
   0x7   : > { %p162_p2 = scmp.eq.s32.totalorder %s493_s24, 1  ;;  %p167_p3 = scmp.ne.s32.totalorder %s655_s19, %s651_s18 }
   0x8   : > { %s859_s26 = smov (%p32_p0, %s30_s26), 0  ;;  %p168_p5 = scmp.eq.s32.totalorder %s494_s25, 1 }
   0x9   : > { %p747_p4 = por %p162_p2, %p161_p1  ;;  %s146_s29 = ssub.s32 %s667_s22, %s859_s26 }
   0xa   : > { %p497_p6 = scmp.ge.s32.totalorder %s671_s23, 1  ;;  %p149_p7 = scmp.eq.s32.totalorder %s146_s29, 0 }
   0xb   : > { %p754_p8 = por %p168_p5, %p167_p3  ;;  %p209_p9 = scmp.lt.s32.totalorder %s671_s23, 3 }
   0xc   : > { %s760_s6 = scalar_select %p149_p7, %s659_s20, %s151_s27  }
   0xd   : > { %p210_p10 = pnand %p497_p6, %p209_p9 }
   0xe   : > { %p240_p11 = scmp.lt.s32.totalorder (!%p210_p10), %s663_s21, 1  ;;  %v591_v0 = vld [vmem:[%s846_s1] sm:$0xff] (!%p210_p10)   ;;  %vm290_vm0 = vcmask (!%p210_p10), 130048   ;;  %v258_v2 = vld [vmem:[%s847_s2 + $0x10] sm:$0xff] (!%p210_p10)  ;;  %v673_v3 = vmov (!%p210_p10), 0   ;;  %v257_v4 = vld [vmem:[%s847_s2 + $0x8] sm:$0xff] (!%p210_p10) }
   0xf   : > { %213 = sbr.rel (%p210_p10) target bundleno = 489 (0x1e9), region = 40  ;;  %519 = vmatprep.mubr.msk.bf16.mxu0 (!%p210_p10), %vm290_vm0, %v591_v0  ;;  %v256_v1 = vld [vmem:[%s847_s2] sm:$0xff] (!%p210_p10)  ;;  %589 = vset.pattern.permute.xlu0 (!%p210_p10), %v673_v3  ;;  %v259_v5 = vld [vmem:[%s847_s2 + $0x18] sm:$0xff] (!%p210_p10)  ;;  %v592_v9 = vld [vmem:[%s846_s1 + $0x8] sm:$0xff] (!%p210_p10)   ;;  %v674_v11 = vmov (!%p210_p10), 0.0   ;;  %vm675_vm1 = vmmov (!%p210_p10), 0  }
  0x10   : > { %590 = vset.pattern.permute.xlu1 (!%p210_p10), %v673_v3  ;;  %262 = vperm.xlu0 (!%p210_p10), %589, %v256_v1   ;;  %v353_v10 = vld [vmem:[%s849_s4] sm:$0xf] (!%p210_p10)  ;;  %vm359_vm2 = vcmask (!%p210_p10), 261120   ;;  %s237_s13 = sand.u32 (!%p210_p10), 1, %s655_s19   ;;  %s507_s15 = sshll.u32 (!%p210_p10), %s663_s21, 6 }
  0x11   : > { %272 = vperm.xlu1 (!%p210_p10), %590, %v258_v2   ;;  %523 = vmatprep.subr.bf16.mxu1 (!%p210_p10), %v674_v11  ;;  %v350_v30 = vld [vmem:[%s848_s3] sm:$0x3] (!%p210_p10)  ;;  %s798_s27 = scalar_lea.hbm (!%p210_p10), %s850_s5, %s507_s15  ;;  %s676_s7 = smov (!%p210_p10), [#allocation2]  }
  0x12   : > { %527 = vmatprep.mubr.msk.bf16.mxu1 (!%p210_p10), %vm675_vm1, %v674_v11  ;;  %s597_s8 = sshll.u32 (!%p210_p10), %s676_s7, 4  ;;  %s598_s8 = int_to_ptr.vmem [resolvable:$false] %s597_s8 }
  0x14   : > { %267 = vperm.xlu0 (!%p210_p10), %589, %v257_v4  }
  0x15   : > { %277 = vperm.xlu1 (!%p210_p10), %590, %v259_v5  }
  0x16   : > { %s241_s9 = scalar_select %p240_p11, %s663_s21, 1 }
  0x17   : > { %s405_s21 = scalar_lea.sflag [#allocation3], %s237_s13 }
  0x18   : > { %s510_s14 = sshll.u32 %s241_s9, 4  ;;  %356 = vperm.xlu0 %589, %v353_v10   ;;  %s599_s9 = scalar_lea.vmem %s598_s8, 128 }
  0x19   : > { %s247_s17 = scalar_lea.vmem %s845_s0, %s510_s14  ;;  %s498_s14 = sshll.u32 %s237_s13, 2 }
  0x1a   : > { %v249_v6 = vld [vmem:[%s247_s17] sm:$0xff]  ;;  %v250_v7 = vld [vmem:[%s247_s17 + $0x8] sm:$0xff]  ;;  %s239_s16 = scalar_lea.vmem [#allocation2], %s498_s14 }
  0x1b   : > { %v251_v8 = vpack.c.bf16 %v250_v7, %v249_v6  ;;  %s419_s17 = sshll.u32 %s239_s16, 4  ;;  %s800_s17 = int_to_ptr.vmem [resolvable:$true] %s419_s17 }
  0x1c   : > { %s593_s29 = scalar_lea.vmem %s800_s17, 64  ;;  %p600_p1 = scmp.lt.s32.totalorder %s800_s17, %s598_s8 }
  0x1d   : > { %517 = vmatprep.subr.bf16.mxu0 %v251_v8  ;;  %p594_p12 = scmp.ne.s32.totalorder %s800_s17, %s593_s29  ;;  %p601_p2 = scmp.lt.s32.totalorder %s599_s9, %s593_s29 }
  0x1e   : > { %518 = vmatpush3.bf16.msra.mxu0 %v251_v8 }
  0x1f   : > { %p595_p13 = pnand %p594_p12, %p747_p4  ;;  %p602_p3 = por %p601_p2, %p600_p1 }
  0x21   : > { %520 = vmatmul.mubr.msk.bf16.vlgmr.msra.gmra.mrb[0].mxu0 %vm290_vm0, %v592_v9  ;;  %p596_p0 = pneg %p595_p13 }
  0x23   : > { %p603_p5 = pnand %p602_p3, %p596_p0 }
  0x8f   : > { %v263_v13 = vpop.permute.xlu0 %262 }
  0x90   : > { %v273_v12 = vpop.permute.xlu1 %272 }
  0x93   : > { %v268_v20 = vpop.permute.xlu0 %267 }
  0x94   : > { %v278_v15 = vpop.permute.xlu1 %277 }
  0x97   : > { %v357_v31 = vpop.permute.xlu0 %356 }
  0xf4   : > { %v521_v14 = vpop.f32.mrb[0].mxu0 }
  0xf5   : > { %v340_v16 = vadd.f32 %v521_v14, %v273_v12  ;;  %v331_v17 = vpop.f32.mrb[1].mxu0 }
  0xf6   : > { %v332_v18 = vadd.f32 %v331_v17, %v263_v13  ;;  %v522_v19 = vpop.f32.mrb[2].mxu0 }
  0xf7   : > { %v343_v21 = vadd.f32 %v522_v19, %v278_v15  ;;  %v334_v22 = vpop.f32.mrb[3].mxu0  ;;  %v348_v24 = vmax.f32 %v340_v16, 0.0 }
  0xf8   : > { %v335_v23 = vadd.f32 %v334_v22, %v268_v20  ;;  %v346_v26 = vmax.f32 %v332_v18, 0.0 }
  0xf9   : > { %v349_v25 = vmax.f32 %v343_v21, 0.0 }
  0xfa   : > { %v347_v27 = vmax.f32 %v335_v23, 0.0 }
  0xfb   : > { %v352_v28 = vpack.c.bf16 %v349_v25, %v348_v24 }
  0xfc   : > { %v351_v29 = vpack.c.bf16 %v347_v27, %v346_v26 }
  0xfe   : > { %524 = vmatpush3.bf16.msra.mxu1 %v351_v29 }
  0xff   : > { %525 = vmatprep.subr.bf16.mxu1 %v674_v11 }
 0x102   : > { %526 = vmatpush3.bf16.msra.mxu1 %v352_v28 }
 0x105   : > { %528 = vmatmul.mubr.msk.bf16.vlgmr.msra.gmra.mrb[0].mxu1 %vm359_vm2, %v350_v30 }
 0x1d8   : > { %v397_v32 = vpop.f32.mrb[0].mxu1 }
 0x1d9   : > { %v398_v33 = vadd.f32 %v397_v32, %v357_v31  ;;  %v529_v34 = vpop.f32.mrb[1].mxu1 }
 0x1da   : > { %v400_v35 = vpop.f32.mrb[2].mxu1 }
 0x1db   : > { %403 = vst [vmem:[%s239_s16] sm:$0xf] %v398_v33  ;;  %v530_v36 = vpop.f32.mrb[3].mxu1 }
 0x1dc   : > { %606 = shalt.err (!%p603_p5)
}
 0x1dd   : > { %s607_s10 = scalar_lea.hbm %s798_s27, 64  ;;  %s611_s13 = scalar_lea.hbm %s850_s5, 128 }
 0x1de   : > { %p608_p6 = scmp.ne.s32.totalorder %s798_s27, %s607_s10  ;;  %p612_p10 = scmp.lt.u32.totalorder %s798_s27, %s850_s5 }
 0x1df   : > { %p613_p11 = scmp.lt.u32.totalorder %s611_s13, %s607_s10  ;;  %p615_p13 = scmp.lt.u32.totalorder %s607_s10, %s798_s27 }
 0x1e0   : > { %p609_p7 = pnand %p608_p6, %p747_p4 }
 0x1e1   : > { %p614_p12 = por %p613_p11, %p612_p10 }
 0x1e2   : > { %p610_p9 = pneg %p609_p7 }
 0x1e3   : > { %p616_p0 = por %p615_p13, %p614_p12 }
 0x1e5   : > { %p617_p1 = pnand %p616_p0, %p610_p9 }
 0x1e7   : > { %620 = shalt.err (!%p617_p1)
}
 0x1e8   : > { %531 = dma.vmem_to_hbm [thread:$0]  (%p747_p4), %s800_s17, 64, %s798_s27, %s405_s21  }
 0x1e9 PF: > { %p537_p2 = scmp.ge.s32.totalorder %s671_s23, 2  ;;  %s431_s16 = sand.u32 1, %s651_s18  }
 0x1ea   : > { %s432_s24 = scalar_lea.sflag [#allocation3], %s431_s16 }
 0x1eb   : > { %p534_p3 = pnand %p537_p2, %p754_p8 }
 0x1ed   : > { %646 = dma.done.wait (!%p534_p3), %s432_s24, 64  }
 0x1ee   : > { %648 = vsyncadd (!%p534_p3), %s432_s24, 4294967232  ;;  %s18_s23 = sadd.s32 1, %s671_s23   ;;  %s853_s18 = smov %s655_s19 }
 0x1ef   : > { %p15_p5 = scmp.ge.s32.totalorder %s18_s23, 4   ;;  %s854_s19 = smov %s659_s20 }
 0x1f0   : > { %s855_s20 = smov %s760_s6  ;;  %s856_s21 = smov %s667_s22 }
 0x1f1   : > { %s857_s22 = smov %s859_s26  ;;  %17 = sbr.rel (!%p15_p5) target bundleno = 4 (0x4), region = 75 }
 0x1f8   :  { %437 = vsyncpa [#allocation3], 1 }
 0x1f9   :  { %439 = vsyncpa [#allocation3 + $0x1], 1 }

</bundles_post_ra>
